<compile_context>
chip_gen: v6e
topology: v6e:2x2x1
jax: 0.10.0
libtpu: 0.0.40
codegen_flags: <defaults>
</compile_context>

<pallas_src>
import math

import jax
import jax.numpy as jnp
from jax.experimental import pallas as pl
from jax.experimental.pallas import tpu as pltpu


def _round_up(n, m):
    return ((n + m - 1) // m) * m


def _feature_regression_kernel(x_ref, wt_ref, d_ref, b_ref, o_ref):
    """o = x @ W^T + b - x * diag(W); MXU matmul with f32 accumulation."""
    x = x_ref[...]                                     # (TB, D), possibly bf16
    # wt_ref holds W^T (pre-transposed once in the wrapper) -> native MXU feed.
    acc = jnp.dot(x, wt_ref[...], preferred_element_type=jnp.float32)  # (TB, D) f32
    # Epilogue in f32 (v5e VPU/EUP have no bf16): bias add + diagonal removal.
    acc = acc + b_ref[...] - x.astype(jnp.float32) * d_ref[...]
    o_ref[...] = acc.astype(o_ref.dtype)


def feature_regression(x, W, b, *, block_b=512, matmul_dtype=None):
    """z_h = x @ (W * (1 - I))^T + b via a batch-tiled Pallas kernel.

    x : (B, D)   W : (D, D) PyTorch linear layout (out, in)   b : (D,)
    matmul_dtype: optional dtype (e.g. jnp.bfloat16) for the MXU operands.
    """
    B, D = x.shape
    out_dtype = x.dtype

    # Optional bf16 feeding of the MXU (v6e/v7x fast path). The diag
    # correction below is derived from the SAME rounded weights so the
    # subtraction still cancels the diagonal contribution exactly.
    if matmul_dtype is not None:
        x_in = x.astype(matmul_dtype)
        W_in = W.astype(matmul_dtype)
    else:
        x_in = x
        W_in = W

    # One-time transpose in HBM (amortized over all batch tiles); diag(W^T) == diag(W).
    Wt = W_in.T
    d_vec = jnp.diagonal(W_in).astype(jnp.float32).reshape(1, D)
    b2d = b.astype(jnp.float32).reshape(1, D)

    # Fallback pad only for B < 8 (sublane minimum). For B >= 8 we rely on
    # Mosaic's masked ragged final block instead of an extra HBM pass over x.
    b_eff = B
    if B < 8:
        x_in = jnp.pad(x_in, ((0, 8 - B), (0, 0)))
        b_eff = 8

    # Batch tile: multiple of 8 sublanes, no larger than the batch itself.
    tb = max(8, (min(block_b, b_eff) // 8) * 8)
    grid = (pl.cdiv(b_eff, tb),)

    # Raise the scoped VMEM limit only when the resident footprint needs it.
    x_item = jnp.dtype(x_in.dtype).itemsize
    w_item = jnp.dtype(Wt.dtype).itemsize
    o_item = jnp.dtype(out_dtype).itemsize
    footprint = (2 * tb * D * x_item          # x tiles, double-buffered
                 + 2 * tb * D * o_item        # out tiles, double-buffered
                 + D * D * w_item             # W^T, single-buffered
                 + 4 * D * 4)                 # diag + bias (f32)
    vmem_limit = None
    if footprint > 30 * 1024 * 1024:
        vmem_limit = min(int(footprint * 1.25), 112 * 1024 * 1024)

    out = pl.pallas_call(
        _feature_regression_kernel,
        out_shape=jax.ShapeDtypeStruct((b_eff, D), out_dtype),
        grid=grid,
        in_specs=[
            # x tile: streamed / double-buffered along the batch grid.
            pl.BlockSpec((tb, D), lambda i: (i, 0)),
            # Grid-invariant operands: single-buffered, VMEM-resident.
            pl.BlockSpec((D, D), lambda i: (0, 0), pipeline_mode=pl.Buffered(1)),
            pl.BlockSpec((1, D), lambda i: (0, 0), pipeline_mode=pl.Buffered(1)),
            pl.BlockSpec((1, D), lambda i: (0, 0), pipeline_mode=pl.Buffered(1)),
        ],
        out_specs=pl.BlockSpec((tb, D), lambda i: (i, 0)),
        compiler_params=pltpu.CompilerParams(
            dimension_semantics=("parallel",),   # shard batch tiles on v7x megacore
            vmem_limit_bytes=vmem_limit,
        ),
    )(x_in, Wt, d_vec, b2d)

    return out[:B] if b_eff != B else out


def feature_regression_ref(x, W, b, m):
    return x @ (W * m).T + b


if __name__ == "__main__":
    batch = 16
    input_size = 32

    key = jax.random.PRNGKey(0)
    kx, kw, kb = jax.random.split(key, 3)

    # Deterministic parameter init mirroring reset_parameters():
    # uniform(-stdv, stdv) with stdv = 1/sqrt(input_size).
    stdv = 1.0 / math.sqrt(input_size)
    W = jax.random.uniform(
        kw, (input_size, input_size), jnp.float32, minval=-stdv, maxval=stdv
    )
    b = jax.random.uniform(
        kb, (input_size,), jnp.float32, minval=-stdv, maxval=stdv
    )
    m = 1.0 - jnp.eye(input_size, dtype=jnp.float32)  # registered buffer (ref only)

    x = jax.random.normal(kx, (batch, input_size), jnp.float32)
    ref = feature_regression_ref(x, W, b, m)

    # 1) Default large-tile path (single grid step at this batch size).
    out = jax.block_until_ready(feature_regression(x, W, b))
    assert out.shape == (batch, input_size)
    assert jnp.allclose(out, ref, atol=1e-5, rtol=1e-5), "mismatch (default tile)"

    # 2) Multi-step pipelined grid (block_b=8 -> 2 batch tiles).
    out2 = jax.block_until_ready(feature_regression(x, W, b, block_b=8))
    assert jnp.allclose(out2, ref, atol=1e-5, rtol=1e-5), "mismatch (tiled grid)"

    # 3) Ragged batch (B=13, tb=8 -> masked final block, no jnp.pad of x).
    x3 = x[:13]
    out3 = jax.block_until_ready(feature_regression(x3, W, b, block_b=8))
    assert out3.shape == (13, input_size)
    assert jnp.allclose(out3, ref[:13], atol=1e-5, rtol=1e-5), "mismatch (ragged B)"

    # 4) Tiny batch (B=2 < 8) exercises the fallback pad path.
    x4 = x[:2]
    out4 = jax.block_until_ready(feature_regression(x4, W, b))
    assert out4.shape == (2, input_size)
    assert jnp.allclose(out4, ref[:2], atol=1e-5, rtol=1e-5), "mismatch (small B)"

    print("KERNEL_OK")
</pallas_src>

<mosaic_0001>
module attributes {stable_mosaic.version = 11 : i64} {
  func.func @_feature_regression_kernel(%arg0: i32, %arg1: memref<16x32xf32, #tpu.memory_space<vmem>>, %arg2: memref<32x32xf32, #tpu.memory_space<vmem>>, %arg3: memref<1x32xf32, #tpu.memory_space<vmem>>, %arg4: memref<1x32xf32, #tpu.memory_space<vmem>>, %arg5: memref<16x32xf32, #tpu.memory_space<vmem>>) attributes {dimension_semantics = [#tpu.dimension_semantics<parallel>], iteration_bounds = array<i64: 1>, scalar_prefetch = 0 : i64, scratch_operands = 0 : i64, tpu.core_type = #tpu.core_type<tc>, window_params = [{transform_indices = @transform_0, window_bounds = array<i64: 16, 32>}, {pipeline_mode = #tpu.pipeline_mode<synchronous>, transform_indices = @transform_1, window_bounds = array<i64: 32, 32>}, {pipeline_mode = #tpu.pipeline_mode<synchronous>, transform_indices = @transform_2, window_bounds = array<i64: 1, 32>}, {pipeline_mode = #tpu.pipeline_mode<synchronous>, transform_indices = @transform_3, window_bounds = array<i64: 1, 32>}, {transform_indices = @transform_4, window_bounds = array<i64: 16, 32>}]} {
    %c0 = arith.constant 0 : index
    %c0_0 = arith.constant 0 : index
    %0 = vector.load %arg1[%c0, %c0_0] : memref<16x32xf32, #tpu.memory_space<vmem>>, vector<16x32xf32>
    %c0_1 = arith.constant 0 : index
    %c0_2 = arith.constant 0 : index
    %1 = vector.load %arg2[%c0_1, %c0_2] : memref<32x32xf32, #tpu.memory_space<vmem>>, vector<32x32xf32>
    %cst = arith.constant dense<0.000000e+00> : vector<16x32xf32>
    %2 = tpu.matmul %0, %1, %cst {dimension_numbers = #tpu.dot_dimension_numbers<[1], [0], [0], [1], [0, 0, 1, 1], [], []>} : vector<16x32xf32>, vector<32x32xf32>, vector<16x32xf32> -> vector<16x32xf32>
    %c0_3 = arith.constant 0 : index
    %c0_4 = arith.constant 0 : index
    %3 = vector.load %arg4[%c0_3, %c0_4] : memref<1x32xf32, #tpu.memory_space<vmem>>, vector<1x32xf32>
    %4 = vector.broadcast %3 : vector<1x32xf32> to vector<16x32xf32>
    %5 = arith.addf %2, %4 : vector<16x32xf32>
    %c0_5 = arith.constant 0 : index
    %c0_6 = arith.constant 0 : index
    %6 = vector.load %arg3[%c0_5, %c0_6] : memref<1x32xf32, #tpu.memory_space<vmem>>, vector<1x32xf32>
    %7 = vector.broadcast %6 : vector<1x32xf32> to vector<16x32xf32>
    %8 = arith.mulf %0, %7 : vector<16x32xf32>
    %9 = arith.subf %5, %8 : vector<16x32xf32>
    %c0_7 = arith.constant 0 : index
    %c0_8 = arith.constant 0 : index
    %10 = vector.load %arg5[%c0_7, %c0_8] : memref<16x32xf32, #tpu.memory_space<vmem>>, vector<16x32xf32>
    tpu.vector_store %arg5[%c0_7, %c0_8], %9 {strides = array<i32>} : memref<16x32xf32, #tpu.memory_space<vmem>>, vector<16x32xf32>,
    return
  }
  func.func @transform_0(%arg0: i32) -> (i32, i32) {
    %c0_i32 = arith.constant 0 : i32
    %c0_i32_0 = arith.constant 0 : i32
    return %arg0, %c0_i32 : i32, i32
  }
  func.func @transform_1(%arg0: i32) -> (i32, i32) {
    %c0_i32 = arith.constant 0 : i32
    %c0_i32_0 = arith.constant 0 : i32
    %c0_i32_1 = arith.constant 0 : i32
    return %c0_i32, %c0_i32_0 : i32, i32
  }
  func.func @transform_2(%arg0: i32) -> (i32, i32) {
    %c0_i32 = arith.constant 0 : i32
    %c0_i32_0 = arith.constant 0 : i32
    %c0_i32_1 = arith.constant 0 : i32
    return %c0_i32, %c0_i32_0 : i32, i32
  }
  func.func @transform_3(%arg0: i32) -> (i32, i32) {
    %c0_i32 = arith.constant 0 : i32
    %c0_i32_0 = arith.constant 0 : i32
    %c0_i32_1 = arith.constant 0 : i32
    return %c0_i32, %c0_i32_0 : i32, i32
  }
  func.func @transform_4(%arg0: i32) -> (i32, i32) {
    %c0_i32 = arith.constant 0 : i32
    %c0_i32_0 = arith.constant 0 : i32
    return %arg0, %c0_i32 : i32, i32
  }
}

</mosaic_0001>

<bundles_post_ra>
// kernel: tpu_custom_call.1
= control target key start
LH: loop header
LB: loop body
LE: loop exit
PB: predicated region body
PF: predicated region fallthrough
CT: control target
= control target key end

     0   :  { %9 = vsyncpa [#allocation3], 0  ;;  %s322_s0 = inlined_call_operand.hbm [shape: f32[16,32], index: 0, kind: input, shape index: {}]   ;;  %s323_s1 = inlined_call_operand.hbm [shape: f32[32,32], index: 1, kind: input, shape index: {}]   ;;  %s324_s2 = inlined_call_operand.vmem [shape: f32[1,32], index: 2, kind: input, shape index: {}]   ;;  %s325_s3 = inlined_call_operand.vmem [shape: f32[1,32], index: 3, kind: input, shape index: {}]   ;;  %s326_s4 = inlined_call_operand.hbm [shape: f32[16,32], index: 4, kind: output, shape index: {}]  }
   0x1   :  { %10 = vsyncpa [#allocation6], 0 }
   0x2   :  { %11 = vsyncpa [#allocation4], 0  ;;  %s264_s15 = smov [#allocation2]  }
   0x3   :  { %s17_s16 = sshll.u32 %s264_s15, 4  ;;  %s18_s16 = int_to_ptr.vmem [resolvable:$true] %s17_s16 }
   0x4   :  { %s206_s17 = scalar_lea.vmem %s18_s16, 256  ;;  %p211_p1 = scmp.lt.s32.totalorder %s18_s16, %s18_s16 }
   0x5   :  { %p207_p0 = scmp.ne.s32.totalorder %s18_s16, %s206_s17  ;;  %p212_p2 = scmp.lt.s32.totalorder %s206_s17, %s206_s17 }
   0x7   :  { %p213_p3 = por %p212_p2, %p211_p1 }
   0x9   :  { %p214_p4 = pnand %p213_p3, %p207_p0 }
   0xb   :  { %217 = shalt.err (!%p214_p4)
}
   0xc   :  { %s265_s18 = smov 128   ;;  %s266_s19 = smov 8  }
   0xd   :  { %23 = dma.hbm_to_vmem [thread:$0]  %s322_s0, 256, %s18_s16, [#allocation3], %s265_s18, %s265_s18, %s266_s19  }
   0xe   :  { %s267_s22 = smov [#allocation5]  }
   0xf   :  { %s29_s23 = sshll.u32 %s267_s22, 4  ;;  %s30_s23 = int_to_ptr.vmem [resolvable:$true] %s29_s23 }
  0x10   :  { %s226_s24 = scalar_lea.vmem %s30_s23, 512  ;;  %p231_p6 = scmp.lt.s32.totalorder %s30_s23, %s30_s23 }
  0x11   :  { %p227_p5 = scmp.ne.s32.totalorder %s30_s23, %s226_s24  ;;  %p232_p7 = scmp.lt.s32.totalorder %s226_s24, %s226_s24 }
  0x13   :  { %p233_p8 = por %p232_p7, %p231_p6 }
  0x15   :  { %p234_p9 = pnand %p233_p8, %p227_p5 }
  0x17   :  { %237 = shalt.err (!%p234_p9)
}
  0x18   :  { %35 = dma.hbm_to_vmem [thread:$0]  %s323_s1, 512, %s30_s23, [#allocation6], %s265_s18, %s265_s18, %s266_s19  }
  0x19   :  { %258 = dma.done.wait [#allocation3], 256  }
  0x1a   :  { %259 = vsyncadd [#allocation3], 4294967040 }
  0x1b   :  { %260 = dma.done.wait [#allocation6], 512  }
  0x1c   :  { %261 = vsyncadd [#allocation6], 4294966784  ;;  %vm59_vm0 = vcmask 261120   ;;  %v51_v0 = vld [vmem:[#allocation5 + $0x18] sm:$0xff]  ;;  %v50_v1 = vld [vmem:[#allocation5 + $0x10] sm:$0xff]  ;;  %s268_s29 = smov [#allocation7]  }
  0x1d   :  { %182 = vmatprep.subr.mxu0 %v51_v0  ;;  %v46_v2 = vld [vmem:[#allocation2] sm:$0xff]  ;;  %v49_v3 = vld [vmem:[#allocation5 + $0x8] sm:$0xff]  ;;  %v48_v4 = vld [vmem:[#allocation5] sm:$0xff]  ;;  %s159_s30 = sshll.u32 %s268_s29, 4  ;;  %s160_s30 = int_to_ptr.vmem [resolvable:$true] %s159_s30 }
  0x1e   :  { %183 = vmatpush3.msra.mxu0 %v51_v0  ;;  %190 = vmatprep.mubr.msk.f32.mxu0 %vm59_vm0, %v46_v2  ;;  %v47_v5 = vld [vmem:[#allocation2 + $0x8] sm:$0xff]  ;;  %v175_v6 = vld [vmem:[%s324_s2] ss:$0 sm:$0xff]  ;;  %s238_s2 = scalar_lea.vmem %s160_s30, 256  ;;  %p243_p11 = scmp.lt.s32.totalorder %s160_s30, %s160_s30 }
  0x1f   :  { %184 = vmatprep.subr.mxu0 %v50_v1  ;;  %v172_v7 = vld [vmem:[%s325_s3] ss:$0 sm:$0xff]  ;;  %v149_v8 = vmul.f32 %v175_v6, %v47_v5  ;;  %v148_v10 = vmul.f32 %v175_v6, %v46_v2  ;;  %p239_p10 = scmp.ne.s32.totalorder %s160_s30, %s238_s2  ;;  %p244_p12 = scmp.lt.s32.totalorder %s238_s2, %s238_s2 }
  0x20   :  { %185 = vmatpush3.msra.mxu0 %v50_v1 }
  0x21   :  { %186 = vmatprep.subr.mxu0 %v49_v3  ;;  %p245_p13 = por %p244_p12, %p243_p11 }
  0x22   :  { %187 = vmatpush3.msra.mxu0 %v49_v3 }
  0x23   :  { %188 = vmatprep.subr.mxu0 %v48_v4  ;;  %p246_p0 = pnand %p245_p13, %p239_p10 }
  0x24   :  { %189 = vmatpush3.msra.mxu0 %v48_v4 }
  0x25   :  { %191 = vmatmul.mubr.msk.f32.vlgmr.msra.gmra.mxu0 %vm59_vm0, %v47_v5 }
  0xe5   :  { %v192_v9 = vpop.f32.mrf.mxu0 }
  0xe6   :  { %v138_v11 = vadd.f32 %v192_v9, %v172_v7 }
  0xe7   :  { %v132_v12 = vpop.f32.mrf.mxu0 }
  0xe8   :  { %v151_v13 = vsub.f32 %v138_v11, %v149_v8  ;;  %v133_v14 = vadd.f32 %v172_v7, %v132_v12 }
  0xea   :  { %153 = vst.msk [vmem:[#allocation7 + $0x8] sm:$0xff] %vm59_vm0, %v151_v13  ;;  %v150_v15 = vsub.f32 %v133_v14, %v148_v10 }
  0xec   :  { %152 = vst.msk [vmem:[#allocation7] sm:$0xff] %vm59_vm0, %v150_v15 }
  0xed   :  { %249 = shalt.err (!%p246_p0)
}
  0xee   :  { %165 = dma.vmem_to_hbm [thread:$0]  %s160_s30, 256, %s326_s4, [#allocation4], %s265_s18, %s265_s18, %s266_s19  }
  0xef   :  { %262 = dma.done.wait [#allocation4], 256  }
  0xf0   :  { %263 = vsyncadd [#allocation4], 4294967040 }
  0xf1   :  { %169 = vsyncpa [#allocation3], 1 }
  0xf2   :  { %170 = vsyncpa [#allocation6], 1 }
  0xf3   :  { %171 = vsyncpa [#allocation4], 1 }

</bundles_post_ra>
